<compile_context>
chip_gen: v7x
topology: tpu7x:2x2x1
jax: 0.10.0
libtpu: 0.0.40
codegen_flags: <defaults>
</compile_context>

<pallas_src>
import functools

import jax
import jax.numpy as jnp
from jax import lax
from jax.experimental import pallas as pl
from jax.experimental.pallas import tpu as pltpu


def _emaml_kernel(xs_ref, ys_ref, xq_ref, mask_ref, neg_lr_mask_ref,
                  w0_ref, b0_ref, w1c_ref, b1_ref, w2_ref, b2_ref,
                  out_ref, *, inner_lr, n_support, hidden, mb, kb):
    f32 = jnp.float32

    xs = xs_ref[...]                    # [Ns, D]   (resident: constant index_map)
    ys = ys_ref[...]                    # [Ns, 1]
    xq = xq_ref[...]                    # [Nq, D]
    bd_mask = mask_ref[...]             # [MbH, MbH] 0/1 block-diagonal   (resident)
    neg_lr_mask = neg_lr_mask_ref[...]  # -inner_lr * bd_mask             (resident)

    dot = functools.partial(jnp.dot, preferred_element_type=f32)

    # Statically unrolled loop over the Kb member-blocks handled by this step
    # (amortizes fixed per-grid-step pipeline overhead for large ensembles).
    for k in range(kb):
        W0 = w0_ref[k]                  # [D, MbH]    members packed along lanes
        b0 = b0_ref[k]                  # [1, MbH]
        w1c = w1c_ref[k]                # [H, MbH]    compact: member m's W1 in lanes m*H:(m+1)*H
        b1 = b1_ref[k]                  # [1, MbH]
        W2 = w2_ref[k]                  # [1, MbH]    output weights as a row
        b2 = b2_ref[k]                  # [1, MbH]    output bias replicated over member's H lanes

        # Expand compact W1 to the block-diagonal [MbH, MbH] form in-register
        # (tile along sublanes + mask).  Replaces streaming a 75%-zero slab
        # from HBM each step; avoids any persistent scratch so the grid axis
        # stays safely "parallel" across TensorCores.
        W1 = jnp.concatenate([w1c] * mb, axis=0) * bd_mask      # [MbH, MbH]

        # ---- support forward (Mb members at once) ----
        z0 = dot(xs, W0) + b0                                    # [Ns, MbH]
        a0 = jnp.maximum(z0, 0.0)
        z1 = dot(a0, W1) + b1                                    # [Ns, MbH]
        a1 = jnp.maximum(z1, 0.0)
        # Per-member scalar output, replicated across that member's H lanes
        # (bd_mask doubles as the segment-sum-broadcast matrix).
        z2b = dot(a1 * W2, bd_mask) + b2                         # [Ns, MbH]

        # ---- MSE loss gradient wrt output:  L = mean((z2 - y)^2) ----
        dz2b = (2.0 / n_support) * (z2b - ys)                    # [Ns, MbH]

        # ---- manual backprop (exact grads; no explicit transposes) ----
        gW2 = jnp.sum(a1 * dz2b, axis=0, keepdims=True)          # [1, MbH]
        gb2 = jnp.sum(dz2b, axis=0, keepdims=True)               # [1, MbH] (replicated)
        da1 = dz2b * W2                                          # [Ns, MbH]
        dz1 = jnp.where(z1 > 0.0, da1, 0.0)
        gW1 = lax.dot_general(a0, dz1, (((0,), (0,)), ((), ())),
                              preferred_element_type=f32)        # [MbH, MbH] (unmasked)
        gb1 = jnp.sum(dz1, axis=0, keepdims=True)                # [1, MbH]
        da0 = lax.dot_general(dz1, W1, (((1,), (1,)), ((), ())),
                              preferred_element_type=f32)        # [Ns, MbH]
        dz0 = jnp.where(z0 > 0.0, da0, 0.0)
        gW0 = lax.dot_general(xs, dz0, (((0,), (0,)), ((), ())),
                              preferred_element_type=f32)        # [D, MbH]
        gb0 = jnp.sum(dz0, axis=0, keepdims=True)                # [1, MbH]

        # ---- inner SGD step (mask + lr-scale of gW1 fused into one pass) ----
        W0n = W0 - inner_lr * gW0
        b0n = b0 - inner_lr * gb0
        W1n = W1 + gW1 * neg_lr_mask      # == W1 - inner_lr * (gW1 * bd_mask)
        b1n = b1 - inner_lr * gb1
        W2n = W2 - inner_lr * gW2
        b2n = b2 - inner_lr * gb2

        # ---- query forward with adapted weights ----
        h = jnp.maximum(dot(xq, W0n) + b0n, 0.0)
        h = jnp.maximum(dot(h, W1n) + b1n, 0.0)
        out_ref[k] = dot(h * W2n, bd_mask) + b2n     # lane-dense [Nq, MbH] store


def _device_tuning():
    """(lane_fill_target, min_parallel_grid_steps) per TPU generation."""
    try:
        kind = jax.devices()[0].device_kind.lower()
    except Exception:
        kind = ""
    if "v7" in kind or "7x" in kind:
        return 256, 2      # 2 TensorCores: keep >= 2 parallel grid steps
    if "v6" in kind:
        return 256, 1      # 2x256x256 MXU: fill the full 256-lane width
    return 128, 1          # v5e & older: 128 lanes already fill the MXU


def _pick_member_block(M, H, lane_target, min_groups, max_lanes=512):
    """Pick Mb | M.  Priorities: keep >= min_groups grid steps, keep Mb*H a
    multiple of 128 (unmasked lane stores), then get Mb*H close to lane_target."""
    cands = [d for d in range(1, M + 1) if M % d == 0 and d * H <= max_lanes]
    if not cands:
        return 1

    def score(d):
        mbh = d * H
        groups_ok = (M // d) >= min_groups
        lane_dense = (mbh % 128 == 0)
        closeness = -(mbh - lane_target) if mbh >= lane_target \
            else (mbh - lane_target - max_lanes)
        return (groups_ok, lane_dense, closeness)

    return max(cands, key=score)


def _pick_kb(G, min_groups, max_kb=4):
    """Member-blocks per grid step: largest Kb | G keeping >= min_groups steps."""
    best = 1
    for k in range(1, min(max_kb, G) + 1):
        if G % k == 0 and (G // k) >= min_groups:
            best = k
    return best


def emaml_forward(X_train, Y_train, X_test, params, inner_lr):
    """Returns predictions of shape [M, B, Q] (stacked ensemble outputs)."""
    W0, b0, W1, b1, W2, b2 = params
    M, D, H = W0.shape
    B, S, _ = X_train.shape
    _, Q, _ = X_test.shape
    Ns, Nq = B * S, B * Q

    lane_target, min_groups = _device_tuning()
    Mb = _pick_member_block(M, H, lane_target, min_groups)
    G = M // Mb
    MbH = Mb * H
    Kb = _pick_kb(G, min_groups)
    G_steps = G // Kb

    f32 = jnp.float32
    xs = X_train.reshape(Ns, D).astype(f32)
    ys = Y_train.reshape(Ns, 1).astype(f32)
    xq = X_test.reshape(Nq, D).astype(f32)

    # ---- pack Mb ensemble members along the lane dimension (layout plumbing) ----
    W0p = W0.astype(f32).reshape(G, Mb, D, H).transpose(0, 2, 1, 3).reshape(G, D, MbH)
    b0p = b0.astype(f32).reshape(G, 1, MbH)
    # Compact layer-1 weights: W1c[g, i, m*H + j] = W1[member g*Mb+m][i, j]
    W1c = W1.astype(f32).reshape(G, Mb, H, H).transpose(0, 2, 1, 3).reshape(G, H, MbH)
    b1p = b1.astype(f32).reshape(G, 1, MbH)
    W2p = W2.astype(f32).reshape(G, 1, MbH)                       # output weights as rows
    b2p = jnp.broadcast_to(b2.astype(f32).reshape(G, Mb, 1),
                           (G, Mb, H)).reshape(G, 1, MbH)         # bias replicated over H lanes

    # Block-diagonal member mask (built ONCE, resident via constant index_map).
    blk = jnp.arange(MbH, dtype=jnp.int32) // H
    bd_mask = (blk[:, None] == blk[None, :]).astype(f32)          # [MbH, MbH]
    neg_lr_mask = (-float(inner_lr)) * bd_mask                    # fused mask+lr for gW1

    kernel = functools.partial(_emaml_kernel,
                               inner_lr=float(inner_lr),
                               n_support=float(Ns),
                               hidden=H, mb=Mb, kb=Kb)

    # NOTE: pipeline_mode=pl.Buffered(3) on the per-step weight specs is a
    # further option if a profile shows exposed weight DMA; omitted here since
    # the per-step weight fetch is already small (compact W1).
    out = pl.pallas_call(
        kernel,
        out_shape=jax.ShapeDtypeStruct((G, Nq, MbH), f32),
        grid_spec=pltpu.PrefetchScalarGridSpec(
            num_scalar_prefetch=0,
            grid=(G_steps,),
            in_specs=[
                pl.BlockSpec((Ns, D), lambda g: (0, 0)),            # X_support (resident)
                pl.BlockSpec((Ns, 1), lambda g: (0, 0)),            # Y_support (resident)
                pl.BlockSpec((Nq, D), lambda g: (0, 0)),            # X_query   (resident)
                pl.BlockSpec((MbH, MbH), lambda g: (0, 0)),         # bd_mask   (resident)
                pl.BlockSpec((MbH, MbH), lambda g: (0, 0)),         # -lr*mask  (resident)
                pl.BlockSpec((Kb, D, MbH), lambda g: (g, 0, 0)),    # W0 packed
                pl.BlockSpec((Kb, 1, MbH), lambda g: (g, 0, 0)),    # b0 packed
                pl.BlockSpec((Kb, H, MbH), lambda g: (g, 0, 0)),    # W1 compact (no zero padding)
                pl.BlockSpec((Kb, 1, MbH), lambda g: (g, 0, 0)),    # b1 packed
                pl.BlockSpec((Kb, 1, MbH), lambda g: (g, 0, 0)),    # W2 rows packed
                pl.BlockSpec((Kb, 1, MbH), lambda g: (g, 0, 0)),    # b2 replicated
            ],
            out_specs=pl.BlockSpec((Kb, Nq, MbH), lambda g: (g, 0, 0)),
        ),
        compiler_params=pltpu.CompilerParams(
            dimension_semantics=("parallel",)),   # independent member-blocks -> shard across TCs
    )(xs, ys, xq, bd_mask, neg_lr_mask, W0p, b0p, W1c, b1p, W2p, b2p)

    # out[g, n, m*H + h] = prediction of member (g*Mb + m) for query n (replicated over h).
    preds = out.reshape(G, Nq, Mb, H)[:, :, :, 0]       # [G, Nq, Mb]
    preds = preds.transpose(0, 2, 1).reshape(M, Nq)     # [M, Nq]
    return preds.reshape(M, B, Q)


def init_params(key, M, D, H):
    """Deterministic xavier-uniform weights (biases zero), stacked over M members."""
    k0, k1, k2 = jax.random.split(key, 3)

    def xavier(k, shape):
        fan_in, fan_out = shape[1], shape[2]
        bound = (6.0 / (fan_in + fan_out)) ** 0.5
        return jax.random.uniform(k, shape, jnp.float32, -bound, bound)

    W0 = xavier(k0, (M, D, H))
    W1 = xavier(k1, (M, H, H))
    W2 = xavier(k2, (M, H, 1))
    b0 = jnp.zeros((M, 1, H), jnp.float32)
    b1 = jnp.zeros((M, 1, H), jnp.float32)
    b2 = jnp.zeros((M, 1, 1), jnp.float32)
    return W0, b0, W1, b1, W2, b2


def ref_forward(X_train, Y_train, X_test, params, inner_lr):
    """Pure-JAX reference using jax.grad (mirrors torch.autograd.grad)."""
    W0, b0, W1, b1, W2, b2 = params
    B, S, D = X_train.shape
    _, Q, _ = X_test.shape
    xs = X_train.reshape(B * S, D)
    ys = Y_train.reshape(B * S)
    xq = X_test.reshape(B * Q, D)

    def mlp(p, x):
        w0, bb0, w1, bb1, w2, bb2 = p
        h = jnp.maximum(x @ w0 + bb0, 0.0)
        h = jnp.maximum(h @ w1 + bb1, 0.0)
        return h @ w2 + bb2

    def one(w0, bb0, w1, bb1, w2, bb2):
        p = (w0, bb0, w1, bb1, w2, bb2)

        def loss_fn(p):
            out = mlp(p, xs)[:, 0]
            return jnp.mean((out - ys) ** 2)

        g = jax.grad(loss_fn)(p)
        p_new = tuple(pi - inner_lr * gi for pi, gi in zip(p, g))
        return mlp(p_new, xq)[:, 0]

    preds = jax.vmap(one)(W0, b0, W1, b1, W2, b2)  # [M, B*Q]
    return preds.reshape(W0.shape[0], B, Q)


if __name__ == "__main__":
    # Small shapes consistent with EMAML.forward:
    #   X_train: [B, S, D], Y_train: [B, S], X_test: [B, Q, D]
    M = 4          # num_mamls (ensemble size)
    B = 2          # tasks per mini-batch
    S = 8          # support_size
    Q = 8          # query_size
    D = 4          # input_dim
    H = 32         # hidden_units (hidden_layers = 2)
    INNER_LR = 0.1

    key = jax.random.PRNGKey(0)
    kx, ky, kq, kp = jax.random.split(key, 4)
    X_train = jax.random.normal(kx, (B, S, D), jnp.float32)
    Y_train = jax.random.normal(ky, (B, S), jnp.float32)
    X_test = jax.random.normal(kq, (B, Q, D), jnp.float32)

    params = init_params(kp, M, D, H)

    y_pred = emaml_forward(X_train, Y_train, X_test, params, INNER_LR)
    y_pred = jax.block_until_ready(y_pred)

    y_ref = jax.block_until_ready(
        ref_forward(X_train, Y_train, X_test, params, INNER_LR))

    assert y_pred.shape == (M, B, Q), y_pred.shape
    assert jnp.allclose(y_pred, y_ref, rtol=2e-3, atol=2e-3), (
        float(jnp.max(jnp.abs(y_pred - y_ref))))

    print("KERNEL_OK")
</pallas_src>

<mosaic_0001>
module attributes {stable_mosaic.version = 11 : i64} {
  func.func @_emaml_kernel(%arg0: i32, %arg1: memref<16x4xf32, #tpu.memory_space<vmem>>, %arg2: memref<16x1xf32, #tpu.memory_space<vmem>>, %arg3: memref<16x4xf32, #tpu.memory_space<vmem>>, %arg4: memref<128x128xf32, #tpu.memory_space<vmem>>, %arg5: memref<128x128xf32, #tpu.memory_space<vmem>>, %arg6: memref<1x4x128xf32, #tpu.memory_space<vmem>>, %arg7: memref<1x1x128xf32, #tpu.memory_space<vmem>>, %arg8: memref<1x32x128xf32, #tpu.memory_space<vmem>>, %arg9: memref<1x1x128xf32, #tpu.memory_space<vmem>>, %arg10: memref<1x1x128xf32, #tpu.memory_space<vmem>>, %arg11: memref<1x1x128xf32, #tpu.memory_space<vmem>>, %arg12: memref<1x16x128xf32, #tpu.memory_space<vmem>>) attributes {dimension_semantics = [#tpu.dimension_semantics<parallel>], iteration_bounds = array<i64: 1>, scalar_prefetch = 0 : i64, scratch_operands = 0 : i64, tpu.core_type = #tpu.core_type<tc>, window_params = [{pipeline_mode = #tpu.pipeline_mode<synchronous>, transform_indices = @transform_0, window_bounds = array<i64: 16, 4>}, {pipeline_mode = #tpu.pipeline_mode<synchronous>, transform_indices = @transform_1, window_bounds = array<i64: 16, 1>}, {pipeline_mode = #tpu.pipeline_mode<synchronous>, transform_indices = @transform_2, window_bounds = array<i64: 16, 4>}, {pipeline_mode = #tpu.pipeline_mode<synchronous>, transform_indices = @transform_3, window_bounds = array<i64: 128, 128>}, {pipeline_mode = #tpu.pipeline_mode<synchronous>, transform_indices = @transform_4, window_bounds = array<i64: 128, 128>}, {transform_indices = @transform_5, window_bounds = array<i64: 1, 4, 128>}, {transform_indices = @transform_6, window_bounds = array<i64: 1, 1, 128>}, {transform_indices = @transform_7, window_bounds = array<i64: 1, 32, 128>}, {transform_indices = @transform_8, window_bounds = array<i64: 1, 1, 128>}, {transform_indices = @transform_9, window_bounds = array<i64: 1, 1, 128>}, {transform_indices = @transform_10, window_bounds = array<i64: 1, 1, 128>}, {transform_indices = @transform_11, window_bounds = array<i64: 1, 16, 128>}]} {
    %c0 = arith.constant 0 : index
    %c0_0 = arith.constant 0 : index
    %0 = vector.load %arg1[%c0, %c0_0] : memref<16x4xf32, #tpu.memory_space<vmem>>, vector<16x4xf32>
    %c0_1 = arith.constant 0 : index
    %c0_2 = arith.constant 0 : index
    %1 = vector.load %arg2[%c0_1, %c0_2] : memref<16x1xf32, #tpu.memory_space<vmem>>, vector<16x1xf32>
    %c0_3 = arith.constant 0 : index
    %c0_4 = arith.constant 0 : index
    %2 = vector.load %arg3[%c0_3, %c0_4] : memref<16x4xf32, #tpu.memory_space<vmem>>, vector<16x4xf32>
    %c0_5 = arith.constant 0 : index
    %c0_6 = arith.constant 0 : index
    %3 = vector.load %arg4[%c0_5, %c0_6] : memref<128x128xf32, #tpu.memory_space<vmem>>, vector<128x128xf32>
    %c0_7 = arith.constant 0 : index
    %c0_8 = arith.constant 0 : index
    %4 = vector.load %arg5[%c0_7, %c0_8] : memref<128x128xf32, #tpu.memory_space<vmem>>, vector<128x128xf32>
    %c0_9 = arith.constant 0 : index
    %c0_10 = arith.constant 0 : index
    %c0_11 = arith.constant 0 : index
    %5 = vector.load %arg6[%c0_9, %c0_10, %c0_11] : memref<1x4x128xf32, #tpu.memory_space<vmem>>, vector<1x4x128xf32>
    %6 = vector.shape_cast %5 : vector<1x4x128xf32> to vector<4x128xf32>
    %c0_12 = arith.constant 0 : index
    %c0_13 = arith.constant 0 : index
    %c0_14 = arith.constant 0 : index
    %7 = vector.load %arg7[%c0_12, %c0_13, %c0_14] : memref<1x1x128xf32, #tpu.memory_space<vmem>>, vector<1x1x128xf32>
    %8 = vector.shape_cast %7 : vector<1x1x128xf32> to vector<1x128xf32>
    %c0_15 = arith.constant 0 : index
    %c0_16 = arith.constant 0 : index
    %c0_17 = arith.constant 0 : index
    %9 = vector.load %arg8[%c0_15, %c0_16, %c0_17] : memref<1x32x128xf32, #tpu.memory_space<vmem>>, vector<1x32x128xf32>
    %10 = vector.shape_cast %9 : vector<1x32x128xf32> to vector<32x128xf32>
    %c0_18 = arith.constant 0 : index
    %c0_19 = arith.constant 0 : index
    %c0_20 = arith.constant 0 : index
    %11 = vector.load %arg9[%c0_18, %c0_19, %c0_20] : memref<1x1x128xf32, #tpu.memory_space<vmem>>, vector<1x1x128xf32>
    %12 = vector.shape_cast %11 : vector<1x1x128xf32> to vector<1x128xf32>
    %c0_21 = arith.constant 0 : index
    %c0_22 = arith.constant 0 : index
    %c0_23 = arith.constant 0 : index
    %13 = vector.load %arg10[%c0_21, %c0_22, %c0_23] : memref<1x1x128xf32, #tpu.memory_space<vmem>>, vector<1x1x128xf32>
    %14 = vector.shape_cast %13 : vector<1x1x128xf32> to vector<1x128xf32>
    %c0_24 = arith.constant 0 : index
    %c0_25 = arith.constant 0 : index
    %c0_26 = arith.constant 0 : index
    %15 = vector.load %arg11[%c0_24, %c0_25, %c0_26] : memref<1x1x128xf32, #tpu.memory_space<vmem>>, vector<1x1x128xf32>
    %16 = vector.shape_cast %15 : vector<1x1x128xf32> to vector<1x128xf32>
    %17 = tpu.concatenate %10, %10, %10, %10 in 0 : vector<32x128xf32>, vector<32x128xf32>, vector<32x128xf32>, vector<32x128xf32> -> vector<128x128xf32>
    %18 = arith.mulf %17, %3 : vector<128x128xf32>
    %cst = arith.constant dense<0.000000e+00> : vector<16x128xf32>
    %19 = tpu.matmul %0, %6, %cst {dimension_numbers = #tpu.dot_dimension_numbers<[1], [0], [0], [1], [0, 0, 1, 1], [], []>} : vector<16x4xf32>, vector<4x128xf32>, vector<16x128xf32> -> vector<16x128xf32>
    %20 = vector.broadcast %8 : vector<1x128xf32> to vector<16x128xf32>
    %21 = arith.addf %19, %20 : vector<16x128xf32>
    %cst_27 = arith.constant 0.000000e+00 : f32
    %22 = vector.broadcast %cst_27 : f32 to vector<16x128xf32>
    %23 = arith.maximumf %21, %22 : vector<16x128xf32>
    %cst_28 = arith.constant dense<0.000000e+00> : vector<16x128xf32>
    %24 = tpu.matmul %23, %18, %cst_28 {dimension_numbers = #tpu.dot_dimension_numbers<[1], [0], [0], [1], [0, 0, 1, 1], [], []>} : vector<16x128xf32>, vector<128x128xf32>, vector<16x128xf32> -> vector<16x128xf32>
    %25 = vector.broadcast %12 : vector<1x128xf32> to vector<16x128xf32>
    %26 = arith.addf %24, %25 : vector<16x128xf32>
    %cst_29 = arith.constant 0.000000e+00 : f32
    %27 = vector.broadcast %cst_29 : f32 to vector<16x128xf32>
    %28 = arith.maximumf %26, %27 : vector<16x128xf32>
    %29 = vector.broadcast %14 : vector<1x128xf32> to vector<16x128xf32>
    %30 = arith.mulf %28, %29 : vector<16x128xf32>
    %cst_30 = arith.constant dense<0.000000e+00> : vector<16x128xf32>
    %31 = tpu.matmul %30, %3, %cst_30 {dimension_numbers = #tpu.dot_dimension_numbers<[1], [0], [0], [1], [0, 0, 1, 1], [], []>} : vector<16x128xf32>, vector<128x128xf32>, vector<16x128xf32> -> vector<16x128xf32>
    %32 = vector.broadcast %16 : vector<1x128xf32> to vector<16x128xf32>
    %33 = arith.addf %31, %32 : vector<16x128xf32>
    %34 = vector.broadcast %1 : vector<16x1xf32> to vector<16x128xf32>
    %35 = arith.subf %33, %34 : vector<16x128xf32>
    %cst_31 = arith.constant 1.250000e-01 : f32
    %36 = vector.broadcast %cst_31 : f32 to vector<16x128xf32>
    %37 = arith.mulf %36, %35 : vector<16x128xf32>
    %38 = arith.mulf %28, %37 : vector<16x128xf32>
    %cst_32 = arith.constant dense<0.000000e+00> : vector<128xf32>
    %39 = vector.multi_reduction <add>, %38, %cst_32 [0] : vector<16x128xf32> to vector<128xf32>
    %40 = vector.shape_cast %39 : vector<128xf32> to vector<1x128xf32>
    %cst_33 = arith.constant dense<0.000000e+00> : vector<128xf32>
    %41 = vector.multi_reduction <add>, %37, %cst_33 [0] : vector<16x128xf32> to vector<128xf32>
    %42 = vector.shape_cast %41 : vector<128xf32> to vector<1x128xf32>
    %43 = vector.broadcast %14 : vector<1x128xf32> to vector<16x128xf32>
    %44 = arith.mulf %37, %43 : vector<16x128xf32>
    %cst_34 = arith.constant 0.000000e+00 : f32
    %45 = vector.broadcast %cst_34 : f32 to vector<16x128xf32>
    %46 = arith.cmpf ogt, %26, %45 : vector<16x128xf32>
    %cst_35 = arith.constant 0.000000e+00 : f32
    %47 = vector.broadcast %cst_35 : f32 to vector<16x128xf32>
    %48 = arith.select %46, %44, %47 : vector<16x128xi1>, vector<16x128xf32>
    %cst_36 = arith.constant dense<0.000000e+00> : vector<128x128xf32>
    %49 = tpu.matmul %23, %48, %cst_36 {dimension_numbers = #tpu.dot_dimension_numbers<[0], [0], [1], [1], [0, 1, 1, 1], [], []>} : vector<16x128xf32>, vector<16x128xf32>, vector<128x128xf32> -> vector<128x128xf32>
    %cst_37 = arith.constant dense<0.000000e+00> : vector<128xf32>
    %50 = vector.multi_reduction <add>, %48, %cst_37 [0] : vector<16x128xf32> to vector<128xf32>
    %51 = vector.shape_cast %50 : vector<128xf32> to vector<1x128xf32>
    %cst_38 = arith.constant dense<0.000000e+00> : vector<16x128xf32>
    %52 = tpu.matmul %48, %18, %cst_38 {dimension_numbers = #tpu.dot_dimension_numbers<[1], [1], [0], [0], [0, 0, 1, 0], [], []>} : vector<16x128xf32>, vector<128x128xf32>, vector<16x128xf32> -> vector<16x128xf32>
    %cst_39 = arith.constant 0.000000e+00 : f32
    %53 = vector.broadcast %cst_39 : f32 to vector<16x128xf32>
    %54 = arith.cmpf ogt, %21, %53 : vector<16x128xf32>
    %cst_40 = arith.constant 0.000000e+00 : f32
    %55 = vector.broadcast %cst_40 : f32 to vector<16x128xf32>
    %56 = arith.select %54, %52, %55 : vector<16x128xi1>, vector<16x128xf32>
    %cst_41 = arith.constant dense<0.000000e+00> : vector<4x128xf32>
    %57 = tpu.matmul %0, %56, %cst_41 {dimension_numbers = #tpu.dot_dimension_numbers<[0], [0], [1], [1], [0, 1, 1, 1], [], []>} : vector<16x4xf32>, vector<16x128xf32>, vector<4x128xf32> -> vector<4x128xf32>
    %cst_42 = arith.constant dense<0.000000e+00> : vector<128xf32>
    %58 = vector.multi_reduction <add>, %56, %cst_42 [0] : vector<16x128xf32> to vector<128xf32>
    %59 = vector.shape_cast %58 : vector<128xf32> to vector<1x128xf32>
    %cst_43 = arith.constant 1.000000e-01 : f32
    %60 = vector.broadcast %cst_43 : f32 to vector<4x128xf32>
    %61 = arith.mulf %60, %57 : vector<4x128xf32>
    %62 = arith.subf %6, %61 : vector<4x128xf32>
    %cst_44 = arith.constant 1.000000e-01 : f32
    %63 = vector.broadcast %cst_44 : f32 to vector<1x128xf32>
    %64 = arith.mulf %63, %59 : vector<1x128xf32>
    %65 = arith.subf %8, %64 : vector<1x128xf32>
    %66 = arith.mulf %49, %4 : vector<128x128xf32>
    %67 = arith.addf %18, %66 : vector<128x128xf32>
    %cst_45 = arith.constant 1.000000e-01 : f32
    %68 = vector.broadcast %cst_45 : f32 to vector<1x128xf32>
    %69 = arith.mulf %68, %51 : vector<1x128xf32>
    %70 = arith.subf %12, %69 : vector<1x128xf32>
    %cst_46 = arith.constant 1.000000e-01 : f32
    %71 = vector.broadcast %cst_46 : f32 to vector<1x128xf32>
    %72 = arith.mulf %71, %40 : vector<1x128xf32>
    %73 = arith.subf %14, %72 : vector<1x128xf32>
    %cst_47 = arith.constant 1.000000e-01 : f32
    %74 = vector.broadcast %cst_47 : f32 to vector<1x128xf32>
    %75 = arith.mulf %74, %42 : vector<1x128xf32>
    %76 = arith.subf %16, %75 : vector<1x128xf32>
    %cst_48 = arith.constant dense<0.000000e+00> : vector<16x128xf32>
    %77 = tpu.matmul %2, %62, %cst_48 {dimension_numbers = #tpu.dot_dimension_numbers<[1], [0], [0], [1], [0, 0, 1, 1], [], []>} : vector<16x4xf32>, vector<4x128xf32>, vector<16x128xf32> -> vector<16x128xf32>
    %78 = vector.broadcast %65 : vector<1x128xf32> to vector<16x128xf32>
    %79 = arith.addf %77, %78 : vector<16x128xf32>
    %cst_49 = arith.constant 0.000000e+00 : f32
    %80 = vector.broadcast %cst_49 : f32 to vector<16x128xf32>
    %81 = arith.maximumf %79, %80 : vector<16x128xf32>
    %cst_50 = arith.constant dense<0.000000e+00> : vector<16x128xf32>
    %82 = tpu.matmul %81, %67, %cst_50 {dimension_numbers = #tpu.dot_dimension_numbers<[1], [0], [0], [1], [0, 0, 1, 1], [], []>} : vector<16x128xf32>, vector<128x128xf32>, vector<16x128xf32> -> vector<16x128xf32>
    %83 = vector.broadcast %70 : vector<1x128xf32> to vector<16x128xf32>
    %84 = arith.addf %82, %83 : vector<16x128xf32>
    %cst_51 = arith.constant 0.000000e+00 : f32
    %85 = vector.broadcast %cst_51 : f32 to vector<16x128xf32>
    %86 = arith.maximumf %84, %85 : vector<16x128xf32>
    %87 = vector.broadcast %73 : vector<1x128xf32> to vector<16x128xf32>
    %88 = arith.mulf %86, %87 : vector<16x128xf32>
    %cst_52 = arith.constant dense<0.000000e+00> : vector<16x128xf32>
    %89 = tpu.matmul %88, %3, %cst_52 {dimension_numbers = #tpu.dot_dimension_numbers<[1], [0], [0], [1], [0, 0, 1, 1], [], []>} : vector<16x128xf32>, vector<128x128xf32>, vector<16x128xf32> -> vector<16x128xf32>
    %90 = vector.broadcast %76 : vector<1x128xf32> to vector<16x128xf32>
    %91 = arith.addf %89, %90 : vector<16x128xf32>
    %c0_53 = arith.constant 0 : index
    %c0_54 = arith.constant 0 : index
    %c0_55 = arith.constant 0 : index
    %92 = vector.load %arg12[%c0_53, %c0_54, %c0_55] : memref<1x16x128xf32, #tpu.memory_space<vmem>>, vector<1x16x128xf32>
    %93 = vector.shape_cast %92 : vector<1x16x128xf32> to vector<16x128xf32>
    %94 = vector.shape_cast %91 : vector<16x128xf32> to vector<1x16x128xf32>
    tpu.vector_store %arg12[%c0_53, %c0_54, %c0_55], %94 {strides = array<i32>} : memref<1x16x128xf32, #tpu.memory_space<vmem>>, vector<1x16x128xf32>,
    return
  }
  func.func @transform_0(%arg0: i32) -> (i32, i32) {
    %c0_i32 = arith.constant 0 : i32
    %c0_i32_0 = arith.constant 0 : i32
    %c0_i32_1 = arith.constant 0 : i32
    return %c0_i32, %c0_i32_0 : i32, i32
  }
  func.func @transform_1(%arg0: i32) -> (i32, i32) {
    %c0_i32 = arith.constant 0 : i32
    %c0_i32_0 = arith.constant 0 : i32
    %c0_i32_1 = arith.constant 0 : i32
    return %c0_i32, %c0_i32_0 : i32, i32
  }
  func.func @transform_2(%arg0: i32) -> (i32, i32) {
    %c0_i32 = arith.constant 0 : i32
    %c0_i32_0 = arith.constant 0 : i32
    %c0_i32_1 = arith.constant 0 : i32
    return %c0_i32, %c0_i32_0 : i32, i32
  }
  func.func @transform_3(%arg0: i32) -> (i32, i32) {
    %c0_i32 = arith.constant 0 : i32
    %c0_i32_0 = arith.constant 0 : i32
    %c0_i32_1 = arith.constant 0 : i32
    return %c0_i32, %c0_i32_0 : i32, i32
  }
  func.func @transform_4(%arg0: i32) -> (i32, i32) {
    %c0_i32 = arith.constant 0 : i32
    %c0_i32_0 = arith.constant 0 : i32
    %c0_i32_1 = arith.constant 0 : i32
    return %c0_i32, %c0_i32_0 : i32, i32
  }
  func.func @transform_5(%arg0: i32) -> (i32, i32, i32) {
    %c0_i32 = arith.constant 0 : i32
    %c0_i32_0 = arith.constant 0 : i32
    %c0_i32_1 = arith.constant 0 : i32
    return %arg0, %c0_i32, %c0_i32_0 : i32, i32, i32
  }
  func.func @transform_6(%arg0: i32) -> (i32, i32, i32) {
    %c0_i32 = arith.constant 0 : i32
    %c0_i32_0 = arith.constant 0 : i32
    %c0_i32_1 = arith.constant 0 : i32
    return %arg0, %c0_i32, %c0_i32_0 : i32, i32, i32
  }
  func.func @transform_7(%arg0: i32) -> (i32, i32, i32) {
    %c0_i32 = arith.constant 0 : i32
    %c0_i32_0 = arith.constant 0 : i32
    %c0_i32_1 = arith.constant 0 : i32
    return %arg0, %c0_i32, %c0_i32_0 : i32, i32, i32
  }
  func.func @transform_8(%arg0: i32) -> (i32, i32, i32) {
    %c0_i32 = arith.constant 0 : i32
    %c0_i32_0 = arith.constant 0 : i32
    %c0_i32_1 = arith.constant 0 : i32
    return %arg0, %c0_i32, %c0_i32_0 : i32, i32, i32
  }
  func.func @transform_9(%arg0: i32) -> (i32, i32, i32) {
    %c0_i32 = arith.constant 0 : i32
    %c0_i32_0 = arith.constant 0 : i32
    %c0_i32_1 = arith.constant 0 : i32
    return %arg0, %c0_i32, %c0_i32_0 : i32, i32, i32
  }
  func.func @transform_10(%arg0: i32) -> (i32, i32, i32) {
    %c0_i32 = arith.constant 0 : i32
    %c0_i32_0 = arith.constant 0 : i32
    %c0_i32_1 = arith.constant 0 : i32
    return %arg0, %c0_i32, %c0_i32_0 : i32, i32, i32
  }
  func.func @transform_11(%arg0: i32) -> (i32, i32, i32) {
    %c0_i32 = arith.constant 0 : i32
    %c0_i32_0 = arith.constant 0 : i32
    %c0_i32_1 = arith.constant 0 : i32
    return %arg0, %c0_i32, %c0_i32_0 : i32, i32, i32
  }
}

</mosaic_0001>

<bundles_post_ra>
// kernel: tpu_custom_call.1
= control target key start
LH: loop header
LB: loop body
LE: loop exit
PB: predicated region body
PF: predicated region fallthrough
CT: control target
= control target key end

     0   :  { %16 = vsyncpa [#allocation3], 0  ;;  %s2211_s0 = inlined_call_operand.vmem [shape: f32[16,4], index: 0, kind: input, shape index: {}]   ;;  %s2212_s1 = inlined_call_operand.vmem [shape: f32[16,1], index: 1, kind: input, shape index: {}]   ;;  %s2213_s2 = inlined_call_operand.vmem [shape: f32[16,4], index: 2, kind: input, shape index: {}]   ;;  %s2214_s3 = inlined_call_operand.hbm [shape: f32[128,128], index: 3, kind: input, shape index: {}]   ;;  %s2215_s4 = inlined_call_operand.hbm [shape: f32[128,128], index: 4, kind: input, shape index: {}]   ;;  %s2216_s5 = inlined_call_operand.vmem [shape: f32[1,4,128], index: 5, kind: input, shape index: {}]   ;;  %s2217_s6 = inlined_call_operand.vmem [shape: f32[1,1,128], index: 6, kind: input, shape index: {}]   ;;  %s2218_s7 = inlined_call_operand.vmem [shape: f32[1,32,128], index: 7, kind: input, shape index: {}]   ;;  %s2219_s8 = inlined_call_operand.vmem [shape: f32[1,1,128], index: 8, kind: input, shape index: {}]   ;;  %s2220_s9 = inlined_call_operand.vmem [shape: f32[1,1,128], index: 9, kind: input, shape index: {}]   ;;  %s2221_s10 = inlined_call_operand.vmem [shape: f32[1,1,128], index: 10, kind: input, shape index: {}]   ;;  %s2222_s11 = inlined_call_operand.hbm [shape: f32[1,16,128], index: 11, kind: output, shape index: {}]  }
   0x1   :  { %17 = vsyncpa [#allocation6], 0 }
   0x2   :  { %18 = vsyncpa [#allocation4], 0  ;;  %s1800_s17 = smov [#allocation2]   ;;  %s1728_s21 = scalar_lea.hbm %s2214_s3, 2048 }
   0x3   :  { %s30_s18 = sshll.u32 %s1800_s17, 4  ;;  %p1729_p0 = scmp.ne.s32.totalorder %s2214_s3, %s1728_s21  ;;  %s31_s18 = int_to_ptr.vmem [resolvable:$true] %s30_s18 }
   0x4   :  { %p1732_p1 = scmp.lt.u32.totalorder %s1728_s21, %s2214_s3 }
   0x6   :  { %p1734_p2 = pnand %p1732_p1, %p1729_p0 }
   0x8   :  { %1737 = shalt.err (!%p1734_p2)
}
   0x9   :  { %s1738_s26 = scalar_lea.vmem %s31_s18, 2048  ;;  %p1743_p4 = scmp.lt.s32.totalorder %s31_s18, %s31_s18 }
   0xa   :  { %p1739_p3 = scmp.ne.s32.totalorder %s31_s18, %s1738_s26  ;;  %p1744_p5 = scmp.lt.s32.totalorder %s1738_s26, %s1738_s26 }
   0xc   :  { %p1745_p6 = por %p1744_p5, %p1743_p4 }
   0xe   :  { %p1746_p7 = pnand %p1745_p6, %p1739_p3 }
  0x10   :  { %1749 = shalt.err (!%p1746_p7)
}
  0x11   :  { %s1801_s27 = smov 128   ;;  %s1802_s28 = smov 8  }
  0x12   :  { %36 = dma.hbm_to_vmem [thread:$0]  %s2214_s3, 2048, %s31_s18, [#allocation3], %s1801_s27, %s1801_s27, %s1802_s28  }
  0x13   :  { %s1803_s12 = smov [#allocation5]   ;;  %s1750_s16 = scalar_lea.hbm %s2215_s4, 2048 }
  0x14   :  { %s42_s13 = sshll.u32 %s1803_s12, 4  ;;  %p1751_p8 = scmp.ne.s32.totalorder %s2215_s4, %s1750_s16  ;;  %s43_s13 = int_to_ptr.vmem [resolvable:$true] %s42_s13 }
  0x15   :  { %p1754_p9 = scmp.lt.u32.totalorder %s1750_s16, %s2215_s4 }
  0x17   :  { %p1756_p10 = pnand %p1754_p9, %p1751_p8 }
  0x19   :  { %1759 = shalt.err (!%p1756_p10)
}
  0x1a   :  { %s1760_s22 = scalar_lea.vmem %s43_s13, 2048  ;;  %p1765_p12 = scmp.lt.s32.totalorder %s43_s13, %s43_s13 }
  0x1b   :  { %p1761_p11 = scmp.ne.s32.totalorder %s43_s13, %s1760_s22  ;;  %p1766_p13 = scmp.lt.s32.totalorder %s1760_s22, %s1760_s22 }
  0x1d   :  { %p1767_p0 = por %p1766_p13, %p1765_p12 }
  0x1f   :  { %p1768_p1 = pnand %p1767_p0, %p1761_p11 }
  0x21   :  { %1771 = shalt.err (!%p1768_p1)
}
  0x22   :  { %48 = dma.hbm_to_vmem [thread:$0]  %s2215_s4, 2048, %s43_s13, [#allocation6], %s1801_s27, %s1801_s27, %s1802_s28  }
  0x23   :  { %1794 = dma.done.wait [#allocation3], 2048  }
  0x24   :  { %1795 = vsyncadd [#allocation3], 4294965248 }
  0x25   :  { %1796 = dma.done.wait [#allocation6], 2048  }
  0x26   :  { %1797 = vsyncadd [#allocation6], 4294965248  ;;  %vm143_vm0 = vcmask 1043456   ;;  %vm136_vm1 = vcmask 31744   ;;  %v1902_v0 = vld [vmem:[%s2216_s5] sm:$0xf]  ;;  %v131_v53 = vlaneseq }
  0x27   :  { %v1907_v1 = vld [vmem:[%s2211_s0] sm:$0xff]  ;;  %v1912_v2 = vld [vmem:[%s2211_s0 + $0x8] sm:$0xff]  ;;  %1328 = vmatprep.subr.msk.mxu1 %vm143_vm0, %v1902_v0  ;;  %v75_v8 = vld [vmem:[#allocation2 + $0x10] sm:$0xff]  ;;  %vm464_vm2 = vcmask 130048   ;;  %vm1806_vm6 = vmmov 0  }
  0x28   :  { %1330 = vmatprep.mubr.msk.f32.mxu1 %vm136_vm1, %v1907_v1  ;;  %v73_v3 = vld [vmem:[#allocation2] sm:$0xff]  ;;  %v74_v4 = vld [vmem:[#allocation2 + $0x8] sm:$0xff]  ;;  %1329 = vmatpush3.msk.msra.mxu1 %vm143_vm0, %v1902_v0  ;;  %v76_v9 = vld [vmem:[#allocation2 + $0x18] sm:$0xff]  ;;  %v132_v54 = vshrl.u32 %v131_v53, 7 }
  0x29   :  { %v107_v5 = vld [vmem:[%s2218_s7] sm:$0xff]  ;;  %v108_v6 = vld [vmem:[%s2218_s7 + $0x8] sm:$0xff]  ;;  %1331 = vmatmul.mubr.msk.f32.vlgmr.msra.gmra.mrb[0].mxu1 %vm136_vm1, %v1912_v2  ;;  %v109_v11 = vld [vmem:[%s2218_s7 + $0x10] sm:$0xff]  ;;  %v2014_v47 = vpack.c.bf16 %v74_v4, %v73_v3  ;;  %v2016_v48 = vpack.c.bf16 %v76_v9, %v75_v8 }
  0x2a   :  { %v1926_v7 = vmul.f32 %v107_v5, %v73_v3  ;;  %v1930_v10 = vmul.f32 %v108_v6, %v74_v4  ;;  %v110_v12 = vld [vmem:[%s2218_s7 + $0x18] sm:$0xff]  ;;  %v77_v13 = vld [vmem:[#allocation2 + $0x20] sm:$0xff]  ;;  %v1938_v14 = vmul.f32 %v109_v11, %v75_v8  ;;  %v78_v16 = vld [vmem:[#allocation2 + $0x28] sm:$0xff]  ;;  %v2038_v55 = vsub.s32 0, %v132_v54 }
  0x2b   :  { %v1940_v15 = vmul.f32 %v110_v12, %v76_v9  ;;  %v1946_v18 = vmul.f32 %v107_v5, %v77_v13  ;;  %v1948_v19 = vmul.f32 %v108_v6, %v78_v16  ;;  %v79_v21 = vld [vmem:[#allocation2 + $0x30] sm:$0xff]  ;;  %v80_v22 = vld [vmem:[#allocation2 + $0x38] sm:$0xff]  ;;  %v81_v26 = vld [vmem:[#allocation2 + $0x40] sm:$0xff]  ;;  %1581 = vmatprep.subr.bf16.mxu0 %v2014_v47  ;;  %v2021_v49 = vpack.c.bf16 %v78_v16, %v77_v13 }
  0x2c   :  { %v1944_v17 = vpack.c.bf16 %v1930_v10, %v1926_v7  ;;  %v1961_v24 = vmul.f32 %v109_v11, %v79_v21  ;;  %v1963_v25 = vmul.f32 %v110_v12, %v80_v22  ;;  %v82_v27 = vld [vmem:[#allocation2 + $0x48] sm:$0xff]  ;;  %v1971_v29 = vmul.f32 %v107_v5, %v81_v26  ;;  %v83_v31 = vld [vmem:[#allocation2 + $0x50] sm:$0xff]  ;;  %v84_v32 = vld [vmem:[#allocation2 + $0x58] sm:$0xff]  ;;  %1583 = vmatpush3.bf16.msra.mxu0 %v2014_v47 }
  0x2d   :  { %v1952_v20 = vpack.c.bf16 %v1940_v15, %v1938_v14  ;;  %v1959_v23 = vpack.c.bf16 %v1948_v19, %v1946_v18  ;;  %v1973_v30 = vmul.f32 %v108_v6, %v82_v27  ;;  %v1981_v34 = vmul.f32 %v109_v11, %v83_v31  ;;  %v85_v36 = vld [vmem:[#allocation2 + $0x60] sm:$0xff]  ;;  %v86_v37 = vld [vmem:[#allocation2 + $0x68] sm:$0xff]  ;;  %v87_v42 = vld [vmem:[#allocation2 + $0x70] sm:$0xff]  ;;  %1585 = vmatprep.subr.bf16.mxu0 %v2016_v48 }
  0x2e   :  { %1549 = vmatprep.subr.bf16.mxu1 %v1944_v17  ;;  %v1969_v28 = vpack.c.bf16 %v1963_v25, %v1961_v24  ;;  %v1983_v35 = vmul.f32 %v110_v12, %v84_v32  ;;  %v1991_v39 = vmul.f32 %v107_v5, %v85_v36  ;;  %v1993_v40 = vmul.f32 %v108_v6, %v86_v37  ;;  %v88_v43 = vld [vmem:[#allocation2 + $0x78] sm:$0xff]  ;;  %v2043_v56 = vld [vmem:[%s2217_s6] sm:$0x1]  ;;  %v70_v8 = vld [vmem:[%s2212_s1 + $0x8] sm:$0xff] }
  0x2f   :  { %1551 = vmatpush3.bf16.msra.mxu1 %v1944_v17  ;;  %v1979_v33 = vpack.c.bf16 %v1973_v30, %v1971_v29  ;;  %v2004_v44 = vmul.f32 %v109_v11, %v87_v42  ;;  %v2006_v45 = vmul.f32 %v110_v12, %v88_v43  ;;  %v2025_v50 = vpack.c.bf16 %v80_v22, %v79_v21  ;;  %v69_v5 = vld [vmem:[%s2212_s1] sm:$0xff] }
  0x30   :  { %1553 = vmatprep.subr.bf16.mxu1 %v1952_v20  ;;  %v1989_v38 = vpack.c.bf16 %v1983_v35, %v1981_v34  ;;  %v1999_v41 = vpack.c.bf16 %v1993_v40, %v1991_v39  ;;  %1587 = vmatpush3.bf16.msra.mxu0 %v2016_v48  ;;  %v2029_v51 = vpack.c.bf16 %v82_v27, %v81_v26  ;;  %v1804_v6 = vmov 0   ;;  %v2073_v9 = vld [vmem:[%s2219_s8] sm:$0x1] }
  0x31   :  { %v2010_v46 = vpack.c.bf16 %v2006_v45, %v2004_v44  ;;  %1589 = vmatprep.subr.bf16.mxu0 %v2021_v49  ;;  %v2033_v52 = vpack.c.bf16 %v84_v32, %v83_v31  ;;  %v134_v57 = vrot.slane %v2043_v56, %v2038_v55  ;;  %v2053_v3 = vpack.c.bf16 %v86_v37, %v85_v36  ;;  %v2080_v12 = vld [vmem:[%s2220_s9] sm:$0x1] }
  0x32   :  { %v2057_v4 = vpack.c.bf16 %v88_v43, %v87_v42  ;;  %1727 = vset.pattern.permute.xlu0 %v1804_v6  ;;  %v228_v11 = vrot.slane %v2073_v9, %v2038_v55  ;;  %v2107_v37 = vld [vmem:[%s2221_s10] sm:$0x1] }
  0x33   :  { %1555 = vmatpush3.bf16.msra.mxu1 %v1952_v20  ;;  %398 = vperm.xlu0 %1727, %v69_v5   ;;  %v319_v42 = vrot.slane %v2107_v37, %v2038_v55 }
  0x34   :  { %1557 = vmatprep.subr.bf16.mxu1 %v1959_v23  ;;  %1591 = vmatpush3.bf16.msra.mxu0 %v2021_v49 }
  0x35   :  { %1593 = vmatprep.subr.bf16.mxu0 %v2025_v50 }
  0x37   :  { %1559 = vmatpush3.bf16.msra.mxu1 %v1959_v23  ;;  %403 = vperm.xlu0 %1727, %v70_v8  }
  0x38   :  { %1561 = vmatprep.subr.bf16.mxu1 %v1969_v28  ;;  %1595 = vmatpush3.bf16.msra.mxu0 %v2025_v50 }
  0x39   :  { %1597 = vmatprep.subr.bf16.mxu0 %v2029_v51 }
  0x3b   :  { %1563 = vmatpush3.bf16.msra.mxu1 %v1969_v28 }
  0x3c   :  { %1565 = vmatprep.subr.bf16.mxu1 %v1979_v33  ;;  %1599 = vmatpush3.bf16.msra.mxu0 %v2029_v51 }
  0x3d   :  { %1601 = vmatprep.subr.bf16.mxu0 %v2033_v52 }
  0x3f   :  { %1567 = vmatpush3.bf16.msra.mxu1 %v1979_v33 }
  0x40   :  { %1569 = vmatprep.subr.bf16.mxu1 %v1989_v38  ;;  %1603 = vmatpush3.bf16.msra.mxu0 %v2033_v52 }
  0x41   :  { %1605 = vmatprep.subr.bf16.mxu0 %v2053_v3 }
  0x43   :  { %1571 = vmatpush3.bf16.msra.mxu1 %v1989_v38 }
  0x44   :  { %1573 = vmatprep.subr.bf16.mxu1 %v1999_v41  ;;  %1607 = vmatpush3.bf16.msra.mxu0 %v2053_v3 }
  0x45   :  { %1609 = vmatprep.subr.bf16.mxu0 %v2057_v4 }
  0x47   :  { %1575 = vmatpush3.bf16.msra.mxu1 %v1999_v41 }
  0x48   :  { %1577 = vmatprep.subr.bf16.mxu1 %v2010_v46  ;;  %1611 = vmatpush3.bf16.msra.mxu0 %v2057_v4 }
  0x49   :  { %1619 = vmatprep.subr.bf16.mxu0 %v1944_v17 }
  0x4b   :  { %1579 = vmatpush3.bf16.msra.mxu1 %v2010_v46 }
  0x55   :  { %744 = vxpose.xlu0.b32.start [1/2] (short) (narrow) %v1907_v1, 8 }
  0x59   :  { %745 = vxpose.xlu0.b32.end [2/2] (short) (narrow) %v1912_v2, 8  ;;  %v311_v2 = vrot.slane %v2080_v12, %v2038_v55 }
  0xfc   :  { %v1332_v58 = vpop.f32.mrb[0].mxu1 }
  0xfd   :  { %v2047_v59 = vadd.f32 %v1332_v58, %v134_v57  ;;  %v213_v60 = vpop.f32.mrb[1].mxu1 }
  0xfe   :  { %v2049_v61 = vadd.f32 %v213_v60, %v134_v57 }
  0xff   :  { %v223_v63 = vmax.f32 %v2047_v59, 0.0  ;;  %vm741_vm7 = vcmp.gt.f32.partialorder %v2047_v59, 0.0 }
 0x100   :  { %v222_v62 = vmax.f32 %v2049_v61, 0.0  ;;  %vm740_vm8 = vcmp.gt.f32.partialorder %v2049_v61, 0.0 }
 0x101   :  { %vm1652_vm9 = vmpackc.low %vm741_vm7, %vm740_vm8 }
 0x102   :  { %432 = vxpose.xlu1.b32.start [1/2] (short) %v222_v62, 128  ;;  %1365 = vmatprep.mubr.f32.mxu1 %v222_v62 }
 0x103   :  { %1366 = vmatmul.mubr.f32.vlgmr.msra.gmra.mrb[2].mxu1 %v223_v63 }
 0x106   :  { %433 = vxpose.xlu1.b32.end [2/2] (short) %v223_v63, 128 }
 0x1d6   :  { %v1367_v13 = vpop.f32.mrb[2].mxu1 }
 0x1d7   :  { %v2082_v16 = vadd.f32 %v1367_v13, %v228_v11  ;;  %v296_v21 = vpop.f32.mrb[3].mxu1 }
 0x1d8   :  { %v297_v1 = vadd.f32 %v296_v21, %v228_v11 }
 0x1d9   :  { %v306_v22 = vmax.f32 %v2082_v16, 0.0  ;;  %vm429_vm3 = vcmp.gt.f32.partialorder %v2082_v16, 0.0 }
 0x1da   :  { %v305_v26 = vmax.f32 %v297_v1, 0.0  ;;  %vm428_vm4 = vcmp.gt.f32.partialorder %v297_v1, 0.0 }
 0x1db   :  { %v314_v31 = vmul.f32 %v311_v2, %v306_v22  ;;  %vm1613_vm5 = vmpackc.low %vm429_vm3, %vm428_vm4 }
 0x1dc   :  { %v313_v27 = vmul.f32 %v311_v2, %v305_v26 }
 0x1de   :  { %1400 = vmatprep.mubr.f32.mxu0 %v313_v27 }
 0x1df   :  { %1401 = vmatmul.mubr.f32.vlgmr.msra.gmra.mrb[0].mxu0 %v314_v31 }
 0x1e0   :  { %1621 = vmatpush3.bf16.xpose.msra.mxu0 %v1944_v17  ;;  %v448_v17 = vpop.trf.xlu1 }
 0x1e1   :  { %1623 = vmatprep.subr.bf16.mxu0 %v1952_v20  ;;  %1407 = vmatprep.mubr.msk.f32.mxu1 %vm464_vm2, %v448_v17 }
 0x1e8   :  { %1625 = vmatpush3.bf16.xpose.msra.mxu0 %v1952_v20  ;;  %v449_v20 = vpop.trf.xlu1 }
 0x1e9   :  { %1627 = vmatprep.subr.bf16.mxu0 %v1959_v23 }
 0x1f0   :  { %1629 = vmatpush3.bf16.xpose.msra.mxu0 %v1959_v23  ;;  %v450_v23 = vpop.trf.xlu1 }
 0x1f1   :  { %1631 = vmatprep.subr.bf16.mxu0 %v1969_v28 }
 0x1f8   :  { %1633 = vmatpush3.bf16.xpose.msra.mxu0 %v1969_v28  ;;  %v451_v28 = vpop.trf.xlu1 }
 0x1f9   :  { %1635 = vmatprep.subr.bf16.mxu0 %v1979_v33 }
 0x1fc   :  { %v452_v32 = vpop.trf.xlu1 }
 0x200   :  { %1637 = vmatpush3.bf16.xpose.msra.mxu0 %v1979_v33  ;;  %v453_v33 = vpop.trf.xlu1 }
 0x201   :  { %1639 = vmatprep.subr.bf16.mxu0 %v1989_v38 }
 0x204   :  { %v454_v36 = vpop.trf.xlu1 }
 0x208   :  { %1641 = vmatpush3.bf16.xpose.msra.mxu0 %v1989_v38  ;;  %v399_v38 = vpop.permute.xlu0 %398 }
 0x209   :  { %1643 = vmatprep.subr.bf16.mxu0 %v1999_v41 }
 0x20c   :  { %v404_v54 = vpop.permute.xlu0 %403 }
 0x210   :  { %1645 = vmatpush3.bf16.xpose.msra.mxu0 %v1999_v41  ;;  %v455_v41 = vpop.trf.xlu1 }
 0x211   :  { %1647 = vmatprep.subr.bf16.mxu0 %v2010_v46 }
 0x214   :  { %v456_v58 = vpop.trf.xlu1 }
 0x218   :  { %1649 = vmatpush3.bf16.xpose.msra.mxu0 %v2010_v46  ;;  %v457_v27 = vpop.trf.xlu1 }
 0x219   :  { %1687 = vmatprep.subr.bf16.mxu0 %v2014_v47 }
 0x21c   :  { %v458_v16 = vpop.trf.xlu1 }
 0x220   :  { %v459_v1 = vpop.trf.xlu1 }
 0x2b2   :  { %v1402_v43 = vpop.f32.mrb[0].mxu0 }
 0x2b3   :  { %v393_v46 = vadd.f32 %v1402_v43, %v319_v42  ;;  %v387_v53 = vpop.f32.mrb[1].mxu0 }
 0x2b4   :  { %v388_v57 = vadd.f32 %v387_v53, %v319_v42 }
 0x2b5   :  { %v407_v60 = vsub.f32 %v393_v46, %v404_v54 }
 0x2b6   :  { %v406_v62 = vsub.f32 %v388_v57, %v399_v38  ;;  %v90_v57 = vld [vmem:[#allocation5 + $0x8] sm:$0xff] }
 0x2b7   :  { %v409_v63 = vmul.f32 0.125, %v407_v60 }
 0x2b8   :  { %v408_v5 = vmul.f32 0.125, %v406_v62 }
 0x2b9   :  { %v411_v6 = vmul.f32 %v409_v63, %v306_v22  ;;  %v427_v8 = vmul.f32 %v409_v63, %v311_v2 }
 0x2ba   :  { %v410_v11 = vmul.f32 %v408_v5, %v305_v26  ;;  %v2112_v13 = vadd.f32 %v409_v63, %v408_v5  ;;  %v426_v21 = vmul.f32 %v408_v5, %v311_v2 }
 0x2bb   :  { %v431_v31 = vsel %vm429_vm3, %v427_v8, 0.0 }
 0x2bc   :  { %v2114_v17 = vadd.f32 %v411_v6, %v410_v11  ;;  %v430_v43 = vsel %vm428_vm4, %v426_v21, 0.0  ;;  %1463 = vmatprep.mubr.msk.f32.mxu0 %vm428_vm4, %v426_v21  ;;  %v1612_v42 = vpack.c.bf16 %v427_v8, %v426_v21 }
 0x2bd   :  { %1464 = vmatmul.mubr.msk.f32.vlgmr.msra.gmra.mrb[2].mxu0 %vm429_vm3, %v427_v8  ;;  %v2116_v38 = vadd.f32 %v431_v31, %v430_v43  ;;  %v91_v31 = vld [vmem:[#allocation5 + $0x10] sm:$0xff] }
 0x2be   :  { %1614 = vmatprep.subr.msk.bf16.mxu1 %vm1613_vm5, %v1612_v42  ;;  %1689 = vmatpush3.bf16.msra.mxu0 %v2014_v47  ;;  %v460_v47 = vpop.trf.xlu1 }
 0x2bf   :  { %1617 = vmatpush3.bf16.msk.msra.mxu1 %vm1613_vm5, %v1612_v42  ;;  %1691 = vmatprep.subr.bf16.mxu0 %v2016_v48 }
 0x2c2   :  { %1408 = vmatmul.mubr.msk.f32.vlgmr.msra.gmra.mrb[4].mxu1 %vm464_vm2, %v449_v20  ;;  %1693 = vmatpush3.bf16.msra.mxu0 %v2016_v48  ;;  %v461_v48 = vpop.trf.xlu1 }
 0x2c3   :  { %1410 = vmatprep.mubr.msk.f32.mxu1 %vm464_vm2, %v450_v23  ;;  %1695 = vmatprep.subr.bf16.mxu0 %v2021_v49  ;;  %v760_v23 = vpop.trf.xlu0 }
 0x2c6   :  { %1411 = vmatmul.mubr.msk.f32.gmra.mrb[6].mxu1 %vm464_vm2, %v451_v28  ;;  %1697 = vmatpush3.bf16.msra.mxu0 %v2021_v49  ;;  %v462_v49 = vpop.trf.xlu1 }
 0x2c7   :  { %1413 = vmatprep.mubr.msk.f32.mxu1 %vm464_vm2, %v452_v32  ;;  %1699 = vmatprep.subr.bf16.mxu0 %v2025_v50 }
 0x2ca   :  { %1414 = vmatmul.mubr.msk.f32.gmra.mrb[8].mxu1 %vm464_vm2, %v453_v33  ;;  %1701 = vmatpush3.bf16.msra.mxu0 %v2025_v50  ;;  %v463_v50 = vpop.trf.xlu1 }
 0x2cb   :  { %1416 = vmatprep.mubr.msk.f32.mxu1 %vm464_vm2, %v454_v36  ;;  %1703 = vmatprep.subr.bf16.mxu0 %v2029_v51 }
 0x2ce   :  { %1417 = vmatmul.mubr.msk.f32.gmra.mrb[10].mxu1 %vm464_vm2, %v455_v41  ;;  %1705 = vmatpush3.bf16.msra.mxu0 %v2029_v51  ;;  %v1805_v51 = vmov 0.0|0.0  }
 0x2cf   :  { %1419 = vmatprep.mubr.msk.f32.mxu1 %vm464_vm2, %v456_v58  ;;  %1707 = vmatprep.subr.bf16.mxu0 %v2033_v52  ;;  %v89_v58 = vld [vmem:[#allocation5] sm:$0xff] }
 0x2d0   :  { %1650 = vmatprep.subr.bf16.mxu1 %v1805_v51 }
 0x2d2   :  { %1420 = vmatmul.mubr.msk.f32.gmra.mrb[12].mxu1 %vm464_vm2, %v457_v27  ;;  %1709 = vmatpush3.bf16.msra.mxu0 %v2033_v52  ;;  %v1807_v52 = vmov 0.0   ;;  %v92_v27 = vld [vmem:[#allocation5 + $0x18] sm:$0xff] }
 0x2d3   :  { %1422 = vmatprep.mubr.msk.f32.mxu1 %vm464_vm2, %v458_v16  ;;  %1711 = vmatprep.subr.bf16.mxu0 %v2053_v3 }
 0x2d6   :  { %1423 = vmatmul.mubr.msk.f32.gmra.mrb[14].mxu1 %vm464_vm2, %v459_v1  ;;  %1713 = vmatpush3.bf16.msra.mxu0 %v2053_v3 }
 0x2d7   :  { %1425 = vmatprep.mubr.msk.f32.mxu1 %vm464_vm2, %v460_v47  ;;  %1715 = vmatprep.subr.bf16.mxu0 %v2057_v4 }
 0x2da   :  { %1426 = vmatmul.mubr.msk.f32.gmra.mrb[16].mxu1 %vm464_vm2, %v461_v48  ;;  %1717 = vmatpush3.bf16.msra.mxu0 %v2057_v4  ;;  %v94_v48 = vld [vmem:[#allocation5 + $0x28] sm:$0xff] }
 0x2db   :  { %1428 = vmatprep.mubr.msk.f32.mxu1 %vm464_vm2, %v462_v49  ;;  %v93_v49 = vld [vmem:[#allocation5 + $0x20] sm:$0xff] }
 0x2de   :  { %1429 = vmatmul.mubr.msk.f32.gmra.mrb[18].mxu1 %vm464_vm2, %v463_v50 }
 0x2df   :  { %1470 = vmatprep.mubr.msk.f32.mxu1 %vm1806_vm6, %v1807_v52 }
 0x390   :  { %v1465_v3 = vpop.f32.mrb[2].mxu0 }
 0x391   :  { %v743_v2 = vsel %vm741_vm7, %v1465_v3, 0.0  ;;  %v731_v22 = vpop.f32.mrb[3].mxu0 }
 0x392   :  { %v742_v26 = vsel %vm740_vm8, %v731_v22, 0.0  ;;  %v1651_v20 = vpack.c.bf16 %v1465_v3, %v731_v22 }
 0x393   :  { %v2150_v4 = vadd.f32 %v743_v2, %v742_v26  ;;  %v96_v2 = vld [vmem:[#allocation5 + $0x38] sm:$0xff] }
 0x394   :  { %1653 = vmatpush3.bf16.msk.msra.mxu1 %vm1652_vm9, %v1651_v20 }
 0x395   :  { %v1409_v28 = vpop.f32.mrb[4].mxu1 }
 0x396   :  { %v579_v32 = vpop.f32.mrb[5].mxu1  ;;  %v861_v63 = vmul.f32 %v1409_v28, %v90_v57  ;;  %v98_v28 = vld [vmem:[#allocation5 + $0x48] sm:$0xff] }
 0x397   :  { %1471 = vmatmul.mubr.msk.f32.vlgmr.msra.gmra.mrb[20].mxu1 %vm464_vm2, %v760_v23  ;;  %v860_v5 = vmul.f32 %v579_v32, %v89_v58 }
 0x398   :  { %v877_v11 = vadd.f32 %v861_v63, %v1930_v10  ;;  %v102_v63 = vld [vmem:[#allocation5 + $0x68] sm:$0xff] }
 0x399   :  { %v1412_v33 = vpop.f32.mrb[6].mxu1  ;;  %v876_v21 = vadd.f32 %v860_v5, %v1926_v7  ;;  %v95_v7 = vld [vmem:[#allocation5 + $0x30] sm:$0xff] }
 0x39a   :  { %v589_v36 = vpop.f32.mrb[7].mxu1  ;;  %v863_v43 = vmul.f32 %v1412_v33, %v92_v27  ;;  %v103_v27 = vld [vmem:[#allocation5 + $0x70] sm:$0xff] }
 0x39b   :  { %v862_v42 = vmul.f32 %v589_v36, %v91_v31  ;;  %v1654_v16 = vpack.c.bf16 %v877_v11, %v876_v21  ;;  %v104_v21 = vld [vmem:[#allocation5 + $0x78] sm:$0xff] }
 0x39c   :  { %v879_v1 = vadd.f32 %v863_v43, %v1940_v15 }
 0x39d   :  { %v1415_v41 = vpop.f32.mrb[8].mxu1  ;;  %v878_v47 = vadd.f32 %v862_v42, %v1938_v14  ;;  %v97_v14 = vld [vmem:[#allocation5 + $0x40] sm:$0xff] }
 0x39e   :  { %v599_v59 = vpop.f32.mrb[9].mxu1  ;;  %v865_v50 = vmul.f32 %v1415_v41, %v94_v48 }
 0x39f   :  { %v864_v51 = vmul.f32 %v599_v59, %v93_v49  ;;  %v1658_v52 = vpack.c.bf16 %v879_v1, %v878_v47  ;;  %v100_v59 = vld [vmem:[#allocation5 + $0x58] sm:$0xff]  ;;  %v72_v47 = vld [vmem:[%s2213_s2 + $0x8] sm:$0xff] }
 0x3a0   :  { %v881_v3 = vadd.f32 %v865_v50, %v1948_v19 }
 0x3a1   :  { %v1418_v46 = vpop.f32.mrb[10].mxu1  ;;  %v880_v10 = vadd.f32 %v864_v51, %v1946_v18  ;;  %v99_v18 = vld [vmem:[#allocation5 + $0x50] sm:$0xff] }
 0x3a2   :  { %v609_v61 = vpop.f32.mrb[11].mxu1  ;;  %v867_v22 = vmul.f32 %v1418_v46, %v96_v2 }
 0x3a3   :  { %v866_v26 = vmul.f32 %v609_v61, %v95_v7  ;;  %v1662_v20 = vpack.c.bf16 %v881_v3, %v880_v10 }
 0x3a4   :  { %v883_v23 = vadd.f32 %v867_v22, %v1963_v25 }
 0x3a5   :  { %v1421_v53 = vpop.f32.mrb[12].mxu1  ;;  %v882_v15 = vadd.f32 %v866_v26, %v1961_v24  ;;  %v101_v24 = vld [vmem:[#allocation5 + $0x60] sm:$0xff] }
 0x3a6   :  { %v619_v54 = vpop.f32.mrb[13].mxu1  ;;  %v869_v32 = vmul.f32 %v1421_v53, %v98_v28 }
 0x3a7   :  { %v868_v33 = vmul.f32 %v619_v54, %v97_v14  ;;  %v1666_v36 = vpack.c.bf16 %v883_v23, %v882_v15 }
 0x3a8   :  { %v885_v41 = vadd.f32 %v869_v32, %v1973_v30 }
 0x3a9   :  { %v1424_v60 = vpop.f32.mrb[14].mxu1  ;;  %v884_v19 = vadd.f32 %v868_v33, %v1971_v29 }
 0x3aa   :  { %v629_v62 = vpop.f32.mrb[15].mxu1  ;;  %v871_v57 = vmul.f32 %v1424_v60, %v100_v59 }
 0x3ab   :  { %v870_v58 = vmul.f32 %v629_v62, %v99_v18  ;;  %v1670_v46 = vpack.c.bf16 %v885_v41, %v884_v19 }
 0x3ac   :  { %v887_v61 = vadd.f32 %v871_v57, %v1983_v35 }
 0x3ad   :  { %v1427_v6 = vpop.f32.mrb[16].mxu1  ;;  %v886_v25 = vadd.f32 %v870_v58, %v1981_v34 }
 0x3ae   :  { %v639_v8 = vpop.f32.mrb[17].mxu1  ;;  %v873_v5 = vmul.f32 %v1427_v6, %v102_v63  ;;  %v71_v6 = vld [vmem:[%s2213_s2] sm:$0xff]  ;;  %s1808_s2 = smov [#allocation7]  }
 0x3af   :  { %v872_v11 = vmul.f32 %v639_v8, %v101_v24  ;;  %v1674_v53 = vpack.c.bf16 %v887_v61, %v886_v25  ;;  %1475 = vmatprep.mubr.msk.f32.mxu1 %vm136_vm1, %v71_v6  ;;  %s1169_s26 = sshll.u32 %s1808_s2, 4  ;;  %s1170_s26 = int_to_ptr.vmem [resolvable:$true] %s1169_s26 }
 0x3b0   :  { %v889_v54 = vadd.f32 %v873_v5, %v1993_v40  ;;  %s1772_s29 = scalar_lea.vmem %s1170_s26, 256  ;;  %p1777_p3 = scmp.lt.s32.totalorder %s1170_s26, %s1170_s26 }
 0x3b1   :  { %v888_v30 = vadd.f32 %v872_v11, %v1991_v39  ;;  %v1430_v31 = vpop.f32.mrb[18].mxu1  ;;  %p1773_p2 = scmp.ne.s32.totalorder %s1170_s26, %s1772_s29  ;;  %p1778_p4 = scmp.lt.s32.totalorder %s1772_s29, %s1772_s29 }
 0x3b2   :  { %v875_v60 = vmul.f32 %v1430_v31, %v104_v21  ;;  %v649_v62 = vpop.f32.mrb[19].mxu1 }
 0x3b3   :  { %v1678_v29 = vpack.c.bf16 %v889_v54, %v888_v30  ;;  %v874_v43 = vmul.f32 %v649_v62, %v103_v27  ;;  %v420_v54 = vrot.slane %v2112_v13, 4  ;;  %p1779_p5 = por %p1778_p4, %p1777_p3 }
 0x3b4   :  { %v891_v35 = vadd.f32 %v875_v60, %v2006_v45 }
 0x3b5   :  { %v890_v34 = vadd.f32 %v874_v43, %v2004_v44  ;;  %p1780_p6 = pnand %p1779_p5, %p1773_p2 }
 0x3b7   :  { %v1682_v42 = vpack.c.bf16 %v891_v35, %v890_v34 }
 0x46a   :  { %v845_v40 = vpop.f32.mrb[20].mxu1 }
 0x46b   :  { %v856_v39 = vmul.f32 0.1, %v845_v40  ;;  %v1472_v8 = vpop.f32.mrb[21].mxu1 }
 0x46d   :  { %v857_v1 = vsub.f32 %v1902_v0, %v856_v39  ;;  %v850_v0 = vrot.slane %v2150_v4, 4 }
 0x46f   :  { %1473 = vmatprep.subr.msk.mxu1 %vm143_vm0, %v857_v1  ;;  %v851_v44 = vadd.f32 %v850_v0, %v2150_v4  ;;  %v413_v4 = vrot.slane %v2114_v17, 4 }
 0x470   :  { %1474 = vmatpush3.msk.msra.mxu1 %vm143_vm0, %v857_v1 }
 0x471   :  { %1476 = vmatmul.mubr.msk.f32.vlgmr.msra.gmra.mrb[22].mxu1 %vm136_vm1, %v72_v47  ;;  %1655 = vmatprep.subr.bf16.mxu1 %v1654_v16  ;;  %v852_v45 = vrot.slane %v851_v44, 2  ;;  %v414_v15 = vadd.f32 %v413_v4, %v2114_v17 }
 0x472   :  { %1657 = vmatpush3.bf16.msra.mxu1 %v1654_v16 }
 0x473   :  { %1659 = vmatprep.subr.bf16.mxu1 %v1658_v52  ;;  %v853_v16 = vadd.f32 %v852_v45, %v851_v44 }
 0x475   :  { %v854_v48 = vrot.slane %v853_v16, 1 }
 0x476   :  { %1661 = vmatpush3.bf16.msra.mxu1 %v1658_v52 }
 0x477   :  { %1663 = vmatprep.subr.bf16.mxu1 %v1662_v20  ;;  %v855_v49 = vadd.f32 %v854_v48, %v853_v16 }
 0x479   :  { %v858_v50 = vmul.f32 0.1, %v855_v49 }
 0x47a   :  { %1665 = vmatpush3.bf16.msra.mxu1 %v1662_v20  ;;  %v659_v20 = vrot.slane %v2116_v38, 4 }
 0x47b   :  { %1667 = vmatprep.subr.bf16.mxu1 %v1666_v36  ;;  %v859_v51 = vsub.f32 %v2043_v56, %v858_v50  ;;  %v415_v56 = vrot.slane %v414_v15, 2 }
 0x47c   :  { %v660_v23 = vadd.f32 %v659_v20, %v2116_v38 }
 0x47d   :  { %v902_v52 = vrot.slane %v859_v51, %v2038_v55  ;;  %v416_v32 = vadd.f32 %v415_v56, %v414_v15 }
 0x47e   :  { %1669 = vmatpush3.bf16.msra.mxu1 %v1666_v36  ;;  %v661_v28 = vrot.slane %v660_v23, 2 }
 0x47f   :  { %1671 = vmatprep.subr.bf16.mxu1 %v1670_v46  ;;  %v417_v36 = vrot.slane %v416_v32, 1 }
 0x480   :  { %v662_v14 = vadd.f32 %v661_v28, %v660_v23 }
 0x481   :  { %v418_v19 = vadd.f32 %v417_v36, %v416_v32 }
 0x482   :  { %1673 = vmatpush3.bf16.msra.mxu1 %v1670_v46  ;;  %v663_v33 = vrot.slane %v662_v14, 1 }
 0x483   :  { %1675 = vmatprep.subr.bf16.mxu1 %v1674_v53  ;;  %v894_v57 = vmul.f32 0.1, %v418_v19 }
 0x484   :  { %v664_v41 = vadd.f32 %v663_v33, %v662_v14 }
 0x485   :  { %v895_v58 = vsub.f32 %v2080_v12, %v894_v57 }
 0x486   :  { %1677 = vmatpush3.bf16.msra.mxu1 %v1674_v53  ;;  %v892_v59 = vmul.f32 0.1, %v664_v41 }
 0x487   :  { %1679 = vmatprep.subr.bf16.mxu1 %v1678_v29  ;;  %v1077_v24 = vrot.slane %v895_v58, %v2038_v55 }
 0x488   :  { %v893_v18 = vsub.f32 %v2073_v9, %v892_v59  ;;  %v421_v9 = vadd.f32 %v420_v54, %v2112_v13 }
 0x48a   :  { %1681 = vmatpush3.bf16.msra.mxu1 %v1678_v29  ;;  %v994_v46 = vrot.slane %v893_v18, %v2038_v55  ;;  %v422_v30 = vrot.slane %v421_v9, 2 }
 0x48b   :  { %1683 = vmatprep.subr.bf16.mxu1 %v1682_v42 }
 0x48c   :  { %v423_v12 = vadd.f32 %v422_v30, %v421_v9 }
 0x48e   :  { %1685 = vmatpush3.bf16.msra.mxu1 %v1682_v42  ;;  %v424_v21 = vrot.slane %v423_v12, 1 }
 0x490   :  { %v425_v29 = vadd.f32 %v424_v21, %v423_v12 }
 0x492   :  { %v896_v27 = vmul.f32 0.1, %v425_v29 }
 0x494   :  { %v897_v31 = vsub.f32 %v2107_v37, %v896_v27 }
 0x496   :  { %v1085_v60 = vrot.slane %v897_v31, %v2038_v55 }
 0x544   :  { %v1477_v3 = vpop.f32.mrb[22].mxu1 }
 0x545   :  { %v985_v10 = vadd.f32 %v1477_v3, %v902_v52  ;;  %v979_v2 = vpop.f32.mrb[23].mxu1 }
 0x546   :  { %v980_v7 = vadd.f32 %v979_v2, %v902_v52 }
 0x547   :  { %v989_v26 = vmax.f32 %v985_v10, 0.0 }
 0x548   :  { %v988_v22 = vmax.f32 %v980_v7, 0.0 }
 0x54a   :  { %1510 = vmatprep.mubr.f32.mxu1 %v988_v22 }
 0x54b   :  { %1511 = vmatmul.mubr.f32.vlgmr.msra.gmra.mrb[24].mxu1 %v989_v26 }
 0x61e   :  { %v1512_v61 = vpop.f32.mrb[24].mxu1 }
 0x61f   :  { %v1068_v38 = vadd.f32 %v1512_v61, %v994_v46  ;;  %v1062_v25 = vpop.f32.mrb[25].mxu1 }
 0x620   :  { %v1063_v17 = vadd.f32 %v1062_v25, %v994_v46 }
 0x621   :  { %v1072_v63 = vmax.f32 %v1068_v38, 0.0 }
 0x622   :  { %v1071_v5 = vmax.f32 %v1063_v17, 0.0 }
 0x623   :  { %v1080_v11 = vmul.f32 %v1077_v24, %v1072_v63 }
 0x624   :  { %v1079_v53 = vmul.f32 %v1077_v24, %v1071_v5 }
 0x626   :  { %1545 = vmatprep.mubr.f32.mxu0 %v1079_v53 }
 0x627   :  { %1546 = vmatmul.mubr.f32.vlgmr.msra.gmra.mrb[4].mxu0 %v1080_v11 }
 0x6fa   :  { %v1547_v62 = vpop.f32.mrb[4].mxu0 }
 0x6fb   :  { %v1159_v43 = vadd.f32 %v1547_v62, %v1085_v60  ;;  %v1153_v35 = vpop.f32.mrb[5].mxu0 }
 0x6fc   :  { %v1154_v34 = vadd.f32 %v1153_v35, %v1085_v60 }
 0x6fd   :  { %1163 = vst [vmem:[#allocation7 + $0x8] sm:$0xff] %v1159_v43 }
 0x6fe   :  { %1162 = vst [vmem:[#allocation7] sm:$0xff] %v1154_v34 }
 0x6ff   :  { %1783 = shalt.err (!%p1780_p6)
}
 0x700   :  { %s1784_s5 = scalar_lea.hbm %s2222_s11, 256 }
 0x701   :  { %p1785_p7 = scmp.ne.s32.totalorder %s2222_s11, %s1784_s5  ;;  %p1788_p8 = scmp.lt.u32.totalorder %s1784_s5, %s2222_s11 }
 0x703   :  { %p1790_p9 = pnand %p1788_p8, %p1785_p7 }
 0x705   :  { %1793 = shalt.err (!%p1790_p9)
}
 0x706   :  { %1175 = dma.vmem_to_hbm [thread:$0]  %s1170_s26, 256, %s2222_s11, [#allocation4], %s1801_s27, %s1801_s27, %s1802_s28  }
 0x707   :  { %1798 = dma.done.wait [#allocation4], 256  }
 0x708   :  { %1799 = vsyncadd [#allocation4], 4294967040 }
 0x709   :  { %1179 = vsyncpa [#allocation3], 1 }
 0x70a   :  { %1180 = vsyncpa [#allocation6], 1 }
 0x70b   :  { %1181 = vsyncpa [#allocation4], 1 }

</bundles_post_ra>
